<compile_context>
chip_gen: v7x
topology: tpu7x:2x2x1
jax: 0.10.0
libtpu: 0.0.40
codegen_flags: <defaults>
</compile_context>

<pallas_src>
import functools
import math

import jax
import jax.numpy as jnp
import numpy as np
from jax.experimental import pallas as pl
from jax.experimental.pallas import tpu as pltpu

_RANK_INVALID = 1e9          # sentinel rank for masked / unranked / padded horses
_NEG_BIG = -1e30


def _wpl_kernel(z_ref, r_ref, loss_ref, cnt_ref, *, num_horses, top_k, log_decay):
    H = num_horses
    z = z_ref[...]                           # (Hp, TB) scaled scores
    r = r_ref[...]                           # (Hp, TB) ranks, invalid = _RANK_INVALID

    valid = r < (_RANK_INVALID * 0.5)        # bool (Hp, TB)
    n = jnp.sum(valid.astype(jnp.float32), axis=0, keepdims=True)     # (1, TB)

    # pos[i, b] = number of valid horses j with rank[j, b] < rank[i, b]
    pos = jnp.zeros_like(z)
    for j in range(H):
        pos = pos + (r[j:j + 1, :] < r).astype(jnp.float32)

    if top_k is None:
        k = n
    else:
        k = jnp.minimum(n, float(top_k))
    part = jnp.logical_and(valid, pos < k)             # member of the (truncated) list
    contrib = jnp.logical_and(valid, pos < k - 1.0)    # has a loss term (not last pos)

    # Stable suffix logsumexp over the participating set (shared per-lane max).
    zp = jnp.where(part, z, _NEG_BIG)
    m = jnp.max(zp, axis=0, keepdims=True)             # (1, TB)
    e = jnp.exp(zp - m)                                # exactly 0 for non-participants

    s_suffix = jnp.zeros_like(z)
    for j in range(H):
        s_suffix = s_suffix + jnp.where(r[j:j + 1, :] >= r, e[j:j + 1, :], 0.0)

    lse = m + jnp.log(jnp.maximum(s_suffix, 1e-30))
    w = jnp.exp(pos * log_decay)                       # weight_decay ** position
    term = jnp.where(contrib, w * (z - lse), 0.0)

    loss_ref[...] = -jnp.sum(term, axis=0, keepdims=True)             # (1, TB)
    cnt_ref[...] = (n >= 2.0).astype(jnp.float32)                     # batch counted?


def weighted_plackett_luce_loss(scores, rankings, mask, *, temperature=1.0,
                                top_k=None, weight_decay=0.8, reduction="mean",
                                batch_tile=256):
    assert reduction in ("mean", "sum", "none")
    assert weight_decay > 0.0
    B, H = scores.shape
    Hp = max(8, ((H + 7) // 8) * 8)                      # sublane-aligned horse count
    tb = min(int(batch_tile), ((B + 127) // 128) * 128)  # lanes of batches per step
    tb = max(128, (tb // 128) * 128)
    B_pad = ((B + tb - 1) // tb) * tb

    scaled = scores.astype(jnp.float32) / float(temperature)
    keep = jnp.logical_and(mask, rankings > 0)
    r_eff = jnp.where(keep, rankings.astype(jnp.float32), _RANK_INVALID)

    # (H, B) layout: horses on sublanes, batches on lanes; pad to (Hp, B_pad).
    zT = jnp.pad(scaled.T, ((0, Hp - H), (0, B_pad - B)))
    rT = jnp.pad(r_eff.T, ((0, Hp - H), (0, B_pad - B)),
                 constant_values=_RANK_INVALID)

    kernel = functools.partial(
        _wpl_kernel,
        num_horses=H,
        top_k=None if top_k is None else int(top_k),
        log_decay=float(math.log(weight_decay)))

    loss_pb, has_loss_pb = pl.pallas_call(
        kernel,
        out_shape=(jax.ShapeDtypeStruct((1, B_pad), jnp.float32),
                   jax.ShapeDtypeStruct((1, B_pad), jnp.float32)),
        grid=(B_pad // tb,),
        in_specs=[pl.BlockSpec((Hp, tb), lambda c: (0, c)),
                  pl.BlockSpec((Hp, tb), lambda c: (0, c))],
        out_specs=(pl.BlockSpec((1, tb), lambda c: (0, c)),
                   pl.BlockSpec((1, tb), lambda c: (0, c))),
        compiler_params=pltpu.CompilerParams(dimension_semantics=("parallel",)),
    )(zT, rT)

    per_batch = loss_pb[0, :B]
    has_loss = has_loss_pb[0, :B]
    if reduction == "none":
        # TODO(synk): PyTorch returns a variable-length tensor holding only the batches
        # that produced a loss; here we return a dense length-B vector (0 for skipped).
        return per_batch
    total = jnp.sum(per_batch)
    if reduction == "sum":
        return total
    cnt = jnp.sum(has_loss)
    return jnp.where(cnt > 0.0, total / jnp.maximum(cnt, 1.0), 0.0)


def _reference_loss(scores, rankings, mask, temperature=1.0, top_k=None,
                    weight_decay=0.8, reduction="mean"):
    """Loopy numpy reference mirroring the PyTorch module exactly (tie-free ranks)."""
    scores = np.asarray(scores, dtype=np.float64)
    rankings = np.asarray(rankings)
    mask = np.asarray(mask)
    B, _ = scores.shape
    scaled = scores / float(temperature)
    losses = []
    for b in range(B):
        keep = mask[b] & (rankings[b] > 0)
        idx = np.nonzero(keep)[0]
        if idx.size <= 1:
            continue
        s = scaled[b, idx]
        r = rankings[b, idx]
        s = s[np.argsort(r, kind="stable")]
        if top_k is not None:
            s = s[: min(int(top_k), s.size)]
        bl = 0.0
        for i in range(s.size - 1):
            tail = s[i:]
            lse = np.log(np.sum(np.exp(tail - tail.max()))) + tail.max()
            bl -= (weight_decay ** i) * (s[i] - lse)
        losses.append(bl)
    if not losses:
        return 0.0
    arr = np.array(losses)
    return float(arr.mean() if reduction == "mean" else arr.sum())


if __name__ == "__main__":
    key = jax.random.PRNGKey(0)
    B, H = 6, 16
    k1, k2, k3, k4 = jax.random.split(key, 4)

    scores = jax.random.normal(k1, (B, H), dtype=jnp.float32)
    # unique ranks 1..H per row (tie-free, like a real race), ~25% left unranked (0)
    ranks = jnp.argsort(jax.random.uniform(k2, (B, H)), axis=1).astype(jnp.int32) + 1
    ranked = jax.random.uniform(k3, (B, H)) > 0.25
    rankings = jnp.where(ranked, ranks, 0)
    mask = jax.random.uniform(k4, (B, H)) > 0.2
    mask = mask.at[0].set(False)     # batch 0 has no valid horses -> skipped

    configs = [
        dict(temperature=1.5, top_k=None, weight_decay=0.8, reduction="mean"),
        dict(temperature=1.0, top_k=4, weight_decay=0.9, reduction="sum"),
    ]
    for cfg in configs:
        out = weighted_plackett_luce_loss(scores, rankings, mask, **cfg)
        out = jax.block_until_ready(out)
        ref = _reference_loss(scores, rankings, mask, **cfg)
        assert abs(float(out) - ref) < 1e-3 * max(1.0, abs(ref)), (cfg, float(out), ref)

    print("KERNEL_OK")
</pallas_src>

<mosaic_0001>
module attributes {stable_mosaic.version = 11 : i64} {
  func.func @_wpl_kernel(%arg0: i32, %arg1: memref<16x128xf32, #tpu.memory_space<vmem>>, %arg2: memref<16x128xf32, #tpu.memory_space<vmem>>, %arg3: memref<1x128xf32, #tpu.memory_space<vmem>>, %arg4: memref<1x128xf32, #tpu.memory_space<vmem>>) attributes {dimension_semantics = [#tpu.dimension_semantics<parallel>], iteration_bounds = array<i64: 1>, scalar_prefetch = 0 : i64, scratch_operands = 0 : i64, tpu.core_type = #tpu.core_type<tc>, window_params = [{transform_indices = @transform_0, window_bounds = array<i64: 16, 128>}, {transform_indices = @transform_1, window_bounds = array<i64: 16, 128>}, {transform_indices = @transform_2, window_bounds = array<i64: 1, 128>}, {transform_indices = @transform_3, window_bounds = array<i64: 1, 128>}]} {
    %c0 = arith.constant 0 : index
    %c0_0 = arith.constant 0 : index
    %0 = vector.load %arg1[%c0, %c0_0] : memref<16x128xf32, #tpu.memory_space<vmem>>, vector<16x128xf32>
    %c0_1 = arith.constant 0 : index
    %c0_2 = arith.constant 0 : index
    %1 = vector.load %arg2[%c0_1, %c0_2] : memref<16x128xf32, #tpu.memory_space<vmem>>, vector<16x128xf32>
    %cst = arith.constant 5.000000e+08 : f32
    %2 = vector.broadcast %cst : f32 to vector<16x128xf32>
    %3 = arith.cmpf olt, %1, %2 : vector<16x128xf32>
    %4 = arith.extui %3 : vector<16x128xi1> to vector<16x128xi32>
    %5 = arith.sitofp %4 : vector<16x128xi32> to vector<16x128xf32>
    %cst_3 = arith.constant dense<0.000000e+00> : vector<128xf32>
    %6 = vector.multi_reduction <add>, %5, %cst_3 [0] : vector<16x128xf32> to vector<128xf32>
    %7 = vector.shape_cast %6 : vector<128xf32> to vector<1x128xf32>
    %cst_4 = arith.constant 0.000000e+00 : f32
    %8 = vector.broadcast %cst_4 : f32 to vector<16x128xf32>
    %9 = vector.extract_strided_slice %1 {offsets = [0, 0], sizes = [1, 128], strides = [1, 1]} : vector<16x128xf32> to vector<1x128xf32>
    %10 = vector.broadcast %9 : vector<1x128xf32> to vector<16x128xf32>
    %11 = arith.cmpf olt, %10, %1 : vector<16x128xf32>
    %12 = arith.extui %11 : vector<16x128xi1> to vector<16x128xi32>
    %13 = arith.sitofp %12 : vector<16x128xi32> to vector<16x128xf32>
    %14 = arith.addf %8, %13 : vector<16x128xf32>
    %15 = vector.extract_strided_slice %1 {offsets = [1, 0], sizes = [1, 128], strides = [1, 1]} : vector<16x128xf32> to vector<1x128xf32>
    %16 = vector.broadcast %15 : vector<1x128xf32> to vector<16x128xf32>
    %17 = arith.cmpf olt, %16, %1 : vector<16x128xf32>
    %18 = arith.extui %17 : vector<16x128xi1> to vector<16x128xi32>
    %19 = arith.sitofp %18 : vector<16x128xi32> to vector<16x128xf32>
    %20 = arith.addf %14, %19 : vector<16x128xf32>
    %21 = vector.extract_strided_slice %1 {offsets = [2, 0], sizes = [1, 128], strides = [1, 1]} : vector<16x128xf32> to vector<1x128xf32>
    %22 = vector.broadcast %21 : vector<1x128xf32> to vector<16x128xf32>
    %23 = arith.cmpf olt, %22, %1 : vector<16x128xf32>
    %24 = arith.extui %23 : vector<16x128xi1> to vector<16x128xi32>
    %25 = arith.sitofp %24 : vector<16x128xi32> to vector<16x128xf32>
    %26 = arith.addf %20, %25 : vector<16x128xf32>
    %27 = vector.extract_strided_slice %1 {offsets = [3, 0], sizes = [1, 128], strides = [1, 1]} : vector<16x128xf32> to vector<1x128xf32>
    %28 = vector.broadcast %27 : vector<1x128xf32> to vector<16x128xf32>
    %29 = arith.cmpf olt, %28, %1 : vector<16x128xf32>
    %30 = arith.extui %29 : vector<16x128xi1> to vector<16x128xi32>
    %31 = arith.sitofp %30 : vector<16x128xi32> to vector<16x128xf32>
    %32 = arith.addf %26, %31 : vector<16x128xf32>
    %33 = vector.extract_strided_slice %1 {offsets = [4, 0], sizes = [1, 128], strides = [1, 1]} : vector<16x128xf32> to vector<1x128xf32>
    %34 = vector.broadcast %33 : vector<1x128xf32> to vector<16x128xf32>
    %35 = arith.cmpf olt, %34, %1 : vector<16x128xf32>
    %36 = arith.extui %35 : vector<16x128xi1> to vector<16x128xi32>
    %37 = arith.sitofp %36 : vector<16x128xi32> to vector<16x128xf32>
    %38 = arith.addf %32, %37 : vector<16x128xf32>
    %39 = vector.extract_strided_slice %1 {offsets = [5, 0], sizes = [1, 128], strides = [1, 1]} : vector<16x128xf32> to vector<1x128xf32>
    %40 = vector.broadcast %39 : vector<1x128xf32> to vector<16x128xf32>
    %41 = arith.cmpf olt, %40, %1 : vector<16x128xf32>
    %42 = arith.extui %41 : vector<16x128xi1> to vector<16x128xi32>
    %43 = arith.sitofp %42 : vector<16x128xi32> to vector<16x128xf32>
    %44 = arith.addf %38, %43 : vector<16x128xf32>
    %45 = vector.extract_strided_slice %1 {offsets = [6, 0], sizes = [1, 128], strides = [1, 1]} : vector<16x128xf32> to vector<1x128xf32>
    %46 = vector.broadcast %45 : vector<1x128xf32> to vector<16x128xf32>
    %47 = arith.cmpf olt, %46, %1 : vector<16x128xf32>
    %48 = arith.extui %47 : vector<16x128xi1> to vector<16x128xi32>
    %49 = arith.sitofp %48 : vector<16x128xi32> to vector<16x128xf32>
    %50 = arith.addf %44, %49 : vector<16x128xf32>
    %51 = vector.extract_strided_slice %1 {offsets = [7, 0], sizes = [1, 128], strides = [1, 1]} : vector<16x128xf32> to vector<1x128xf32>
    %52 = vector.broadcast %51 : vector<1x128xf32> to vector<16x128xf32>
    %53 = arith.cmpf olt, %52, %1 : vector<16x128xf32>
    %54 = arith.extui %53 : vector<16x128xi1> to vector<16x128xi32>
    %55 = arith.sitofp %54 : vector<16x128xi32> to vector<16x128xf32>
    %56 = arith.addf %50, %55 : vector<16x128xf32>
    %57 = vector.extract_strided_slice %1 {offsets = [8, 0], sizes = [1, 128], strides = [1, 1]} : vector<16x128xf32> to vector<1x128xf32>
    %58 = vector.broadcast %57 : vector<1x128xf32> to vector<16x128xf32>
    %59 = arith.cmpf olt, %58, %1 : vector<16x128xf32>
    %60 = arith.extui %59 : vector<16x128xi1> to vector<16x128xi32>
    %61 = arith.sitofp %60 : vector<16x128xi32> to vector<16x128xf32>
    %62 = arith.addf %56, %61 : vector<16x128xf32>
    %63 = vector.extract_strided_slice %1 {offsets = [9, 0], sizes = [1, 128], strides = [1, 1]} : vector<16x128xf32> to vector<1x128xf32>
    %64 = vector.broadcast %63 : vector<1x128xf32> to vector<16x128xf32>
    %65 = arith.cmpf olt, %64, %1 : vector<16x128xf32>
    %66 = arith.extui %65 : vector<16x128xi1> to vector<16x128xi32>
    %67 = arith.sitofp %66 : vector<16x128xi32> to vector<16x128xf32>
    %68 = arith.addf %62, %67 : vector<16x128xf32>
    %69 = vector.extract_strided_slice %1 {offsets = [10, 0], sizes = [1, 128], strides = [1, 1]} : vector<16x128xf32> to vector<1x128xf32>
    %70 = vector.broadcast %69 : vector<1x128xf32> to vector<16x128xf32>
    %71 = arith.cmpf olt, %70, %1 : vector<16x128xf32>
    %72 = arith.extui %71 : vector<16x128xi1> to vector<16x128xi32>
    %73 = arith.sitofp %72 : vector<16x128xi32> to vector<16x128xf32>
    %74 = arith.addf %68, %73 : vector<16x128xf32>
    %75 = vector.extract_strided_slice %1 {offsets = [11, 0], sizes = [1, 128], strides = [1, 1]} : vector<16x128xf32> to vector<1x128xf32>
    %76 = vector.broadcast %75 : vector<1x128xf32> to vector<16x128xf32>
    %77 = arith.cmpf olt, %76, %1 : vector<16x128xf32>
    %78 = arith.extui %77 : vector<16x128xi1> to vector<16x128xi32>
    %79 = arith.sitofp %78 : vector<16x128xi32> to vector<16x128xf32>
    %80 = arith.addf %74, %79 : vector<16x128xf32>
    %81 = vector.extract_strided_slice %1 {offsets = [12, 0], sizes = [1, 128], strides = [1, 1]} : vector<16x128xf32> to vector<1x128xf32>
    %82 = vector.broadcast %81 : vector<1x128xf32> to vector<16x128xf32>
    %83 = arith.cmpf olt, %82, %1 : vector<16x128xf32>
    %84 = arith.extui %83 : vector<16x128xi1> to vector<16x128xi32>
    %85 = arith.sitofp %84 : vector<16x128xi32> to vector<16x128xf32>
    %86 = arith.addf %80, %85 : vector<16x128xf32>
    %87 = vector.extract_strided_slice %1 {offsets = [13, 0], sizes = [1, 128], strides = [1, 1]} : vector<16x128xf32> to vector<1x128xf32>
    %88 = vector.broadcast %87 : vector<1x128xf32> to vector<16x128xf32>
    %89 = arith.cmpf olt, %88, %1 : vector<16x128xf32>
    %90 = arith.extui %89 : vector<16x128xi1> to vector<16x128xi32>
    %91 = arith.sitofp %90 : vector<16x128xi32> to vector<16x128xf32>
    %92 = arith.addf %86, %91 : vector<16x128xf32>
    %93 = vector.extract_strided_slice %1 {offsets = [14, 0], sizes = [1, 128], strides = [1, 1]} : vector<16x128xf32> to vector<1x128xf32>
    %94 = vector.broadcast %93 : vector<1x128xf32> to vector<16x128xf32>
    %95 = arith.cmpf olt, %94, %1 : vector<16x128xf32>
    %96 = arith.extui %95 : vector<16x128xi1> to vector<16x128xi32>
    %97 = arith.sitofp %96 : vector<16x128xi32> to vector<16x128xf32>
    %98 = arith.addf %92, %97 : vector<16x128xf32>
    %99 = vector.extract_strided_slice %1 {offsets = [15, 0], sizes = [1, 128], strides = [1, 1]} : vector<16x128xf32> to vector<1x128xf32>
    %100 = vector.broadcast %99 : vector<1x128xf32> to vector<16x128xf32>
    %101 = arith.cmpf olt, %100, %1 : vector<16x128xf32>
    %102 = arith.extui %101 : vector<16x128xi1> to vector<16x128xi32>
    %103 = arith.sitofp %102 : vector<16x128xi32> to vector<16x128xf32>
    %104 = arith.addf %98, %103 : vector<16x128xf32>
    %105 = vector.broadcast %7 : vector<1x128xf32> to vector<16x128xf32>
    %106 = arith.cmpf olt, %104, %105 : vector<16x128xf32>
    %107 = arith.andi %3, %106 : vector<16x128xi1>
    %cst_5 = arith.constant 1.000000e+00 : f32
    %108 = vector.broadcast %cst_5 : f32 to vector<1x128xf32>
    %109 = arith.subf %7, %108 : vector<1x128xf32>
    %110 = vector.broadcast %109 : vector<1x128xf32> to vector<16x128xf32>
    %111 = arith.cmpf olt, %104, %110 : vector<16x128xf32>
    %112 = arith.andi %3, %111 : vector<16x128xi1>
    %cst_6 = arith.constant -1.000000e+30 : f32
    %113 = vector.broadcast %cst_6 : f32 to vector<16x128xf32>
    %114 = arith.select %107, %0, %113 : vector<16x128xi1>, vector<16x128xf32>
    %cst_7 = arith.constant dense<0xFF800000> : vector<128xf32>
    %115 = vector.multi_reduction <maximumf>, %114, %cst_7 [0] : vector<16x128xf32> to vector<128xf32>
    %116 = vector.shape_cast %115 : vector<128xf32> to vector<1x128xf32>
    %117 = vector.broadcast %116 : vector<1x128xf32> to vector<16x128xf32>
    %118 = arith.subf %114, %117 : vector<16x128xf32>
    %119 = math.exp %118 : vector<16x128xf32>
    %cst_8 = arith.constant 0.000000e+00 : f32
    %120 = vector.broadcast %cst_8 : f32 to vector<16x128xf32>
    %121 = vector.extract_strided_slice %1 {offsets = [0, 0], sizes = [1, 128], strides = [1, 1]} : vector<16x128xf32> to vector<1x128xf32>
    %122 = vector.broadcast %121 : vector<1x128xf32> to vector<16x128xf32>
    %123 = arith.cmpf oge, %122, %1 : vector<16x128xf32>
    %124 = vector.extract_strided_slice %119 {offsets = [0, 0], sizes = [1, 128], strides = [1, 1]} : vector<16x128xf32> to vector<1x128xf32>
    %cst_9 = arith.constant 0.000000e+00 : f32
    %125 = vector.shape_cast %124 : vector<1x128xf32> to vector<1x128xf32>
    %126 = vector.broadcast %125 : vector<1x128xf32> to vector<16x128xf32>
    %127 = vector.broadcast %cst_9 : f32 to vector<16x128xf32>
    %128 = arith.select %123, %126, %127 : vector<16x128xi1>, vector<16x128xf32>
    %129 = arith.addf %120, %128 : vector<16x128xf32>
    %130 = vector.extract_strided_slice %1 {offsets = [1, 0], sizes = [1, 128], strides = [1, 1]} : vector<16x128xf32> to vector<1x128xf32>
    %131 = vector.broadcast %130 : vector<1x128xf32> to vector<16x128xf32>
    %132 = arith.cmpf oge, %131, %1 : vector<16x128xf32>
    %133 = vector.extract_strided_slice %119 {offsets = [1, 0], sizes = [1, 128], strides = [1, 1]} : vector<16x128xf32> to vector<1x128xf32>
    %cst_10 = arith.constant 0.000000e+00 : f32
    %134 = vector.shape_cast %133 : vector<1x128xf32> to vector<1x128xf32>
    %135 = vector.broadcast %134 : vector<1x128xf32> to vector<16x128xf32>
    %136 = vector.broadcast %cst_10 : f32 to vector<16x128xf32>
    %137 = arith.select %132, %135, %136 : vector<16x128xi1>, vector<16x128xf32>
    %138 = arith.addf %129, %137 : vector<16x128xf32>
    %139 = vector.extract_strided_slice %1 {offsets = [2, 0], sizes = [1, 128], strides = [1, 1]} : vector<16x128xf32> to vector<1x128xf32>
    %140 = vector.broadcast %139 : vector<1x128xf32> to vector<16x128xf32>
    %141 = arith.cmpf oge, %140, %1 : vector<16x128xf32>
    %142 = vector.extract_strided_slice %119 {offsets = [2, 0], sizes = [1, 128], strides = [1, 1]} : vector<16x128xf32> to vector<1x128xf32>
    %cst_11 = arith.constant 0.000000e+00 : f32
    %143 = vector.shape_cast %142 : vector<1x128xf32> to vector<1x128xf32>
    %144 = vector.broadcast %143 : vector<1x128xf32> to vector<16x128xf32>
    %145 = vector.broadcast %cst_11 : f32 to vector<16x128xf32>
    %146 = arith.select %141, %144, %145 : vector<16x128xi1>, vector<16x128xf32>
    %147 = arith.addf %138, %146 : vector<16x128xf32>
    %148 = vector.extract_strided_slice %1 {offsets = [3, 0], sizes = [1, 128], strides = [1, 1]} : vector<16x128xf32> to vector<1x128xf32>
    %149 = vector.broadcast %148 : vector<1x128xf32> to vector<16x128xf32>
    %150 = arith.cmpf oge, %149, %1 : vector<16x128xf32>
    %151 = vector.extract_strided_slice %119 {offsets = [3, 0], sizes = [1, 128], strides = [1, 1]} : vector<16x128xf32> to vector<1x128xf32>
    %cst_12 = arith.constant 0.000000e+00 : f32
    %152 = vector.shape_cast %151 : vector<1x128xf32> to vector<1x128xf32>
    %153 = vector.broadcast %152 : vector<1x128xf32> to vector<16x128xf32>
    %154 = vector.broadcast %cst_12 : f32 to vector<16x128xf32>
    %155 = arith.select %150, %153, %154 : vector<16x128xi1>, vector<16x128xf32>
    %156 = arith.addf %147, %155 : vector<16x128xf32>
    %157 = vector.extract_strided_slice %1 {offsets = [4, 0], sizes = [1, 128], strides = [1, 1]} : vector<16x128xf32> to vector<1x128xf32>
    %158 = vector.broadcast %157 : vector<1x128xf32> to vector<16x128xf32>
    %159 = arith.cmpf oge, %158, %1 : vector<16x128xf32>
    %160 = vector.extract_strided_slice %119 {offsets = [4, 0], sizes = [1, 128], strides = [1, 1]} : vector<16x128xf32> to vector<1x128xf32>
    %cst_13 = arith.constant 0.000000e+00 : f32
    %161 = vector.shape_cast %160 : vector<1x128xf32> to vector<1x128xf32>
    %162 = vector.broadcast %161 : vector<1x128xf32> to vector<16x128xf32>
    %163 = vector.broadcast %cst_13 : f32 to vector<16x128xf32>
    %164 = arith.select %159, %162, %163 : vector<16x128xi1>, vector<16x128xf32>
    %165 = arith.addf %156, %164 : vector<16x128xf32>
    %166 = vector.extract_strided_slice %1 {offsets = [5, 0], sizes = [1, 128], strides = [1, 1]} : vector<16x128xf32> to vector<1x128xf32>
    %167 = vector.broadcast %166 : vector<1x128xf32> to vector<16x128xf32>
    %168 = arith.cmpf oge, %167, %1 : vector<16x128xf32>
    %169 = vector.extract_strided_slice %119 {offsets = [5, 0], sizes = [1, 128], strides = [1, 1]} : vector<16x128xf32> to vector<1x128xf32>
    %cst_14 = arith.constant 0.000000e+00 : f32
    %170 = vector.shape_cast %169 : vector<1x128xf32> to vector<1x128xf32>
    %171 = vector.broadcast %170 : vector<1x128xf32> to vector<16x128xf32>
    %172 = vector.broadcast %cst_14 : f32 to vector<16x128xf32>
    %173 = arith.select %168, %171, %172 : vector<16x128xi1>, vector<16x128xf32>
    %174 = arith.addf %165, %173 : vector<16x128xf32>
    %175 = vector.extract_strided_slice %1 {offsets = [6, 0], sizes = [1, 128], strides = [1, 1]} : vector<16x128xf32> to vector<1x128xf32>
    %176 = vector.broadcast %175 : vector<1x128xf32> to vector<16x128xf32>
    %177 = arith.cmpf oge, %176, %1 : vector<16x128xf32>
    %178 = vector.extract_strided_slice %119 {offsets = [6, 0], sizes = [1, 128], strides = [1, 1]} : vector<16x128xf32> to vector<1x128xf32>
    %cst_15 = arith.constant 0.000000e+00 : f32
    %179 = vector.shape_cast %178 : vector<1x128xf32> to vector<1x128xf32>
    %180 = vector.broadcast %179 : vector<1x128xf32> to vector<16x128xf32>
    %181 = vector.broadcast %cst_15 : f32 to vector<16x128xf32>
    %182 = arith.select %177, %180, %181 : vector<16x128xi1>, vector<16x128xf32>
    %183 = arith.addf %174, %182 : vector<16x128xf32>
    %184 = vector.extract_strided_slice %1 {offsets = [7, 0], sizes = [1, 128], strides = [1, 1]} : vector<16x128xf32> to vector<1x128xf32>
    %185 = vector.broadcast %184 : vector<1x128xf32> to vector<16x128xf32>
    %186 = arith.cmpf oge, %185, %1 : vector<16x128xf32>
    %187 = vector.extract_strided_slice %119 {offsets = [7, 0], sizes = [1, 128], strides = [1, 1]} : vector<16x128xf32> to vector<1x128xf32>
    %cst_16 = arith.constant 0.000000e+00 : f32
    %188 = vector.shape_cast %187 : vector<1x128xf32> to vector<1x128xf32>
    %189 = vector.broadcast %188 : vector<1x128xf32> to vector<16x128xf32>
    %190 = vector.broadcast %cst_16 : f32 to vector<16x128xf32>
    %191 = arith.select %186, %189, %190 : vector<16x128xi1>, vector<16x128xf32>
    %192 = arith.addf %183, %191 : vector<16x128xf32>
    %193 = vector.extract_strided_slice %1 {offsets = [8, 0], sizes = [1, 128], strides = [1, 1]} : vector<16x128xf32> to vector<1x128xf32>
    %194 = vector.broadcast %193 : vector<1x128xf32> to vector<16x128xf32>
    %195 = arith.cmpf oge, %194, %1 : vector<16x128xf32>
    %196 = vector.extract_strided_slice %119 {offsets = [8, 0], sizes = [1, 128], strides = [1, 1]} : vector<16x128xf32> to vector<1x128xf32>
    %cst_17 = arith.constant 0.000000e+00 : f32
    %197 = vector.shape_cast %196 : vector<1x128xf32> to vector<1x128xf32>
    %198 = vector.broadcast %197 : vector<1x128xf32> to vector<16x128xf32>
    %199 = vector.broadcast %cst_17 : f32 to vector<16x128xf32>
    %200 = arith.select %195, %198, %199 : vector<16x128xi1>, vector<16x128xf32>
    %201 = arith.addf %192, %200 : vector<16x128xf32>
    %202 = vector.extract_strided_slice %1 {offsets = [9, 0], sizes = [1, 128], strides = [1, 1]} : vector<16x128xf32> to vector<1x128xf32>
    %203 = vector.broadcast %202 : vector<1x128xf32> to vector<16x128xf32>
    %204 = arith.cmpf oge, %203, %1 : vector<16x128xf32>
    %205 = vector.extract_strided_slice %119 {offsets = [9, 0], sizes = [1, 128], strides = [1, 1]} : vector<16x128xf32> to vector<1x128xf32>
    %cst_18 = arith.constant 0.000000e+00 : f32
    %206 = vector.shape_cast %205 : vector<1x128xf32> to vector<1x128xf32>
    %207 = vector.broadcast %206 : vector<1x128xf32> to vector<16x128xf32>
    %208 = vector.broadcast %cst_18 : f32 to vector<16x128xf32>
    %209 = arith.select %204, %207, %208 : vector<16x128xi1>, vector<16x128xf32>
    %210 = arith.addf %201, %209 : vector<16x128xf32>
    %211 = vector.extract_strided_slice %1 {offsets = [10, 0], sizes = [1, 128], strides = [1, 1]} : vector<16x128xf32> to vector<1x128xf32>
    %212 = vector.broadcast %211 : vector<1x128xf32> to vector<16x128xf32>
    %213 = arith.cmpf oge, %212, %1 : vector<16x128xf32>
    %214 = vector.extract_strided_slice %119 {offsets = [10, 0], sizes = [1, 128], strides = [1, 1]} : vector<16x128xf32> to vector<1x128xf32>
    %cst_19 = arith.constant 0.000000e+00 : f32
    %215 = vector.shape_cast %214 : vector<1x128xf32> to vector<1x128xf32>
    %216 = vector.broadcast %215 : vector<1x128xf32> to vector<16x128xf32>
    %217 = vector.broadcast %cst_19 : f32 to vector<16x128xf32>
    %218 = arith.select %213, %216, %217 : vector<16x128xi1>, vector<16x128xf32>
    %219 = arith.addf %210, %218 : vector<16x128xf32>
    %220 = vector.extract_strided_slice %1 {offsets = [11, 0], sizes = [1, 128], strides = [1, 1]} : vector<16x128xf32> to vector<1x128xf32>
    %221 = vector.broadcast %220 : vector<1x128xf32> to vector<16x128xf32>
    %222 = arith.cmpf oge, %221, %1 : vector<16x128xf32>
    %223 = vector.extract_strided_slice %119 {offsets = [11, 0], sizes = [1, 128], strides = [1, 1]} : vector<16x128xf32> to vector<1x128xf32>
    %cst_20 = arith.constant 0.000000e+00 : f32
    %224 = vector.shape_cast %223 : vector<1x128xf32> to vector<1x128xf32>
    %225 = vector.broadcast %224 : vector<1x128xf32> to vector<16x128xf32>
    %226 = vector.broadcast %cst_20 : f32 to vector<16x128xf32>
    %227 = arith.select %222, %225, %226 : vector<16x128xi1>, vector<16x128xf32>
    %228 = arith.addf %219, %227 : vector<16x128xf32>
    %229 = vector.extract_strided_slice %1 {offsets = [12, 0], sizes = [1, 128], strides = [1, 1]} : vector<16x128xf32> to vector<1x128xf32>
    %230 = vector.broadcast %229 : vector<1x128xf32> to vector<16x128xf32>
    %231 = arith.cmpf oge, %230, %1 : vector<16x128xf32>
    %232 = vector.extract_strided_slice %119 {offsets = [12, 0], sizes = [1, 128], strides = [1, 1]} : vector<16x128xf32> to vector<1x128xf32>
    %cst_21 = arith.constant 0.000000e+00 : f32
    %233 = vector.shape_cast %232 : vector<1x128xf32> to vector<1x128xf32>
    %234 = vector.broadcast %233 : vector<1x128xf32> to vector<16x128xf32>
    %235 = vector.broadcast %cst_21 : f32 to vector<16x128xf32>
    %236 = arith.select %231, %234, %235 : vector<16x128xi1>, vector<16x128xf32>
    %237 = arith.addf %228, %236 : vector<16x128xf32>
    %238 = vector.extract_strided_slice %1 {offsets = [13, 0], sizes = [1, 128], strides = [1, 1]} : vector<16x128xf32> to vector<1x128xf32>
    %239 = vector.broadcast %238 : vector<1x128xf32> to vector<16x128xf32>
    %240 = arith.cmpf oge, %239, %1 : vector<16x128xf32>
    %241 = vector.extract_strided_slice %119 {offsets = [13, 0], sizes = [1, 128], strides = [1, 1]} : vector<16x128xf32> to vector<1x128xf32>
    %cst_22 = arith.constant 0.000000e+00 : f32
    %242 = vector.shape_cast %241 : vector<1x128xf32> to vector<1x128xf32>
    %243 = vector.broadcast %242 : vector<1x128xf32> to vector<16x128xf32>
    %244 = vector.broadcast %cst_22 : f32 to vector<16x128xf32>
    %245 = arith.select %240, %243, %244 : vector<16x128xi1>, vector<16x128xf32>
    %246 = arith.addf %237, %245 : vector<16x128xf32>
    %247 = vector.extract_strided_slice %1 {offsets = [14, 0], sizes = [1, 128], strides = [1, 1]} : vector<16x128xf32> to vector<1x128xf32>
    %248 = vector.broadcast %247 : vector<1x128xf32> to vector<16x128xf32>
    %249 = arith.cmpf oge, %248, %1 : vector<16x128xf32>
    %250 = vector.extract_strided_slice %119 {offsets = [14, 0], sizes = [1, 128], strides = [1, 1]} : vector<16x128xf32> to vector<1x128xf32>
    %cst_23 = arith.constant 0.000000e+00 : f32
    %251 = vector.shape_cast %250 : vector<1x128xf32> to vector<1x128xf32>
    %252 = vector.broadcast %251 : vector<1x128xf32> to vector<16x128xf32>
    %253 = vector.broadcast %cst_23 : f32 to vector<16x128xf32>
    %254 = arith.select %249, %252, %253 : vector<16x128xi1>, vector<16x128xf32>
    %255 = arith.addf %246, %254 : vector<16x128xf32>
    %256 = vector.extract_strided_slice %1 {offsets = [15, 0], sizes = [1, 128], strides = [1, 1]} : vector<16x128xf32> to vector<1x128xf32>
    %257 = vector.broadcast %256 : vector<1x128xf32> to vector<16x128xf32>
    %258 = arith.cmpf oge, %257, %1 : vector<16x128xf32>
    %259 = vector.extract_strided_slice %119 {offsets = [15, 0], sizes = [1, 128], strides = [1, 1]} : vector<16x128xf32> to vector<1x128xf32>
    %cst_24 = arith.constant 0.000000e+00 : f32
    %260 = vector.shape_cast %259 : vector<1x128xf32> to vector<1x128xf32>
    %261 = vector.broadcast %260 : vector<1x128xf32> to vector<16x128xf32>
    %262 = vector.broadcast %cst_24 : f32 to vector<16x128xf32>
    %263 = arith.select %258, %261, %262 : vector<16x128xi1>, vector<16x128xf32>
    %264 = arith.addf %255, %263 : vector<16x128xf32>
    %cst_25 = arith.constant 1.000000e-30 : f32
    %265 = vector.broadcast %cst_25 : f32 to vector<16x128xf32>
    %266 = arith.maximumf %264, %265 : vector<16x128xf32>
    %267 = math.log %266 : vector<16x128xf32>
    %268 = vector.broadcast %116 : vector<1x128xf32> to vector<16x128xf32>
    %269 = arith.addf %268, %267 : vector<16x128xf32>
    %cst_26 = arith.constant -0.223143548 : f32
    %270 = vector.broadcast %cst_26 : f32 to vector<16x128xf32>
    %271 = arith.mulf %104, %270 : vector<16x128xf32>
    %272 = math.exp %271 : vector<16x128xf32>
    %273 = arith.subf %0, %269 : vector<16x128xf32>
    %274 = arith.mulf %272, %273 : vector<16x128xf32>
    %cst_27 = arith.constant 0.000000e+00 : f32
    %275 = vector.broadcast %cst_27 : f32 to vector<16x128xf32>
    %276 = arith.select %112, %274, %275 : vector<16x128xi1>, vector<16x128xf32>
    %cst_28 = arith.constant dense<0.000000e+00> : vector<128xf32>
    %277 = vector.multi_reduction <add>, %276, %cst_28 [0] : vector<16x128xf32> to vector<128xf32>
    %278 = vector.shape_cast %277 : vector<128xf32> to vector<1x128xf32>
    %cst_29 = arith.constant 0.000000e+00 : f32
    %279 = vector.broadcast %cst_29 : f32 to vector<1x128xf32>
    %280 = arith.subf %279, %278 : vector<1x128xf32>
    %c0_30 = arith.constant 0 : index
    %c0_31 = arith.constant 0 : index
    %281 = vector.load %arg3[%c0_30, %c0_31] : memref<1x128xf32, #tpu.memory_space<vmem>>, vector<1x128xf32>
    tpu.vector_store %arg3[%c0_30, %c0_31], %280 {strides = array<i32>} : memref<1x128xf32, #tpu.memory_space<vmem>>, vector<1x128xf32>,
    %cst_32 = arith.constant 2.000000e+00 : f32
    %282 = vector.broadcast %cst_32 : f32 to vector<1x128xf32>
    %283 = arith.cmpf oge, %7, %282 : vector<1x128xf32>
    %284 = arith.extui %283 : vector<1x128xi1> to vector<1x128xi32>
    %285 = arith.sitofp %284 : vector<1x128xi32> to vector<1x128xf32>
    %c0_33 = arith.constant 0 : index
    %c0_34 = arith.constant 0 : index
    %286 = vector.load %arg4[%c0_33, %c0_34] : memref<1x128xf32, #tpu.memory_space<vmem>>, vector<1x128xf32>
    tpu.vector_store %arg4[%c0_33, %c0_34], %285 {strides = array<i32>} : memref<1x128xf32, #tpu.memory_space<vmem>>, vector<1x128xf32>,
    return
  }
  func.func @transform_0(%arg0: i32) -> (i32, i32) {
    %c0_i32 = arith.constant 0 : i32
    %c0_i32_0 = arith.constant 0 : i32
    return %c0_i32, %arg0 : i32, i32
  }
  func.func @transform_1(%arg0: i32) -> (i32, i32) {
    %c0_i32 = arith.constant 0 : i32
    %c0_i32_0 = arith.constant 0 : i32
    return %c0_i32, %arg0 : i32, i32
  }
  func.func @transform_2(%arg0: i32) -> (i32, i32) {
    %c0_i32 = arith.constant 0 : i32
    %c0_i32_0 = arith.constant 0 : i32
    return %c0_i32, %arg0 : i32, i32
  }
  func.func @transform_3(%arg0: i32) -> (i32, i32) {
    %c0_i32 = arith.constant 0 : i32
    %c0_i32_0 = arith.constant 0 : i32
    return %c0_i32, %arg0 : i32, i32
  }
}

</mosaic_0001>

<bundles_post_ra>
// kernel: tpu_custom_call.1
= control target key start
LH: loop header
LB: loop body
LE: loop exit
PB: predicated region body
PF: predicated region fallthrough
CT: control target
= control target key end

     0   :  { %9 = vsyncpa [#allocation3], 0  ;;  %s1142_s0 = inlined_call_operand.hbm [shape: f32[16,128], index: 0, kind: input, shape index: {}]   ;;  %s1143_s1 = inlined_call_operand.hbm [shape: f32[16,128], index: 1, kind: input, shape index: {}]   ;;  %s1144_s2 = inlined_call_operand.hbm [shape: f32[1,128], index: 2, kind: output, shape index: {0}]   ;;  %s1145_s3 = inlined_call_operand.hbm [shape: f32[1,128], index: 3, kind: output, shape index: {1}]  }
   0x1   :  { %10 = vsyncpa [#allocation6], 0 }
   0x2   :  { %11 = vsyncpa [#allocation4], 0 }
   0x3   :  { %12 = vsyncpa [#allocation9], 0  ;;  %s650_s12 = smov [#allocation2]   ;;  %s554_s16 = scalar_lea.hbm %s1142_s0, 256 }
   0x4   :  { %s18_s13 = sshll.u32 %s650_s12, 4  ;;  %p555_p0 = scmp.ne.s32.totalorder %s1142_s0, %s554_s16  ;;  %s19_s13 = int_to_ptr.vmem [resolvable:$true] %s18_s13 }
   0x5   :  { %p558_p1 = scmp.lt.u32.totalorder %s554_s16, %s1142_s0 }
   0x7   :  { %p560_p2 = pnand %p558_p1, %p555_p0 }
   0x9   :  { %563 = shalt.err (!%p560_p2)
}
   0xa   :  { %s564_s21 = scalar_lea.vmem %s19_s13, 256  ;;  %p569_p4 = scmp.lt.s32.totalorder %s19_s13, %s19_s13 }
   0xb   :  { %p565_p3 = scmp.ne.s32.totalorder %s19_s13, %s564_s21  ;;  %p570_p5 = scmp.lt.s32.totalorder %s564_s21, %s564_s21 }
   0xd   :  { %p571_p6 = por %p570_p5, %p569_p4 }
   0xf   :  { %p572_p7 = pnand %p571_p6, %p565_p3 }
  0x11   :  { %575 = shalt.err (!%p572_p7)
}
  0x12   :  { %s651_s22 = smov 128   ;;  %s652_s23 = smov 8  }
  0x13   :  { %24 = dma.hbm_to_vmem [thread:$0]  %s1142_s0, 256, %s19_s13, [#allocation3], %s651_s22, %s651_s22, %s652_s23  }
  0x14   :  { %s653_s26 = smov [#allocation5]   ;;  %s576_s30 = scalar_lea.hbm %s1143_s1, 256 }
  0x15   :  { %s30_s27 = sshll.u32 %s653_s26, 4  ;;  %p577_p8 = scmp.ne.s32.totalorder %s1143_s1, %s576_s30  ;;  %s31_s27 = int_to_ptr.vmem [resolvable:$true] %s30_s27 }
  0x16   :  { %p580_p9 = scmp.lt.u32.totalorder %s576_s30, %s1143_s1 }
  0x18   :  { %p582_p10 = pnand %p580_p9, %p577_p8 }
  0x1a   :  { %585 = shalt.err (!%p582_p10)
}
  0x1b   :  { %s586_s8 = scalar_lea.vmem %s31_s27, 256  ;;  %p591_p12 = scmp.lt.s32.totalorder %s31_s27, %s31_s27 }
  0x1c   :  { %p587_p11 = scmp.ne.s32.totalorder %s31_s27, %s586_s8  ;;  %p592_p13 = scmp.lt.s32.totalorder %s586_s8, %s586_s8 }
  0x1e   :  { %p593_p0 = por %p592_p13, %p591_p12 }
  0x20   :  { %p594_p1 = pnand %p593_p0, %p587_p11 }
  0x22   :  { %597 = shalt.err (!%p594_p1)
}
  0x23   :  { %36 = dma.hbm_to_vmem [thread:$0]  %s1143_s1, 256, %s31_s27, [#allocation6], %s651_s22, %s651_s22, %s652_s23  }
  0x24   :  { %642 = dma.done.wait [#allocation3], 256  }
  0x25   :  { %643 = vsyncadd [#allocation3], 4294967040 }
  0x26   :  { %644 = dma.done.wait [#allocation6], 256  }
  0x27   :  { %645 = vsyncadd [#allocation6], 4294967040  ;;  %v60_v0 = vlaneseq  ;;  %v709_v6 = vld [vmem:[#allocation5] sm:$0xff]  ;;  %v711_v7 = vld [vmem:[#allocation5 + $0x8] sm:$0xff]  ;;  %v654_v14 = vmov 0.0   ;;  %s655_s1 = smov [#allocation8]  }
  0x28   :  { %vm47_vm0 = vcmp.lt.f32.partialorder %v709_v6, 5e+08  ;;  %vm48_vm1 = vcmp.lt.f32.partialorder %v711_v7, 5e+08  ;;  %s485_s10 = sshll.u32 %s655_s1, 4  ;;  %s486_s10 = int_to_ptr.vmem [resolvable:$true] %s485_s10 }
  0x29   :  { %v61_v1 = vshrl.u32 %v60_v0, 7  ;;  %v499_v15 = vsel %vm47_vm0, 1.0, %v654_v14  ;;  %v500_v16 = vsel %vm48_vm1, 1.0, %v654_v14  ;;  %s598_s11 = scalar_lea.vmem %s486_s10, 16  ;;  %s602_s12 = scalar_lea.vmem %s486_s10, 32 }
  0x2a   :  { %v53_v19 = vadd.f32 %v500_v16, %v499_v15  ;;  %p599_p2 = scmp.ne.s32.totalorder %s486_s10, %s598_s11  ;;  %p603_p3 = scmp.lt.s32.totalorder %s486_s10, %s486_s10 }
  0x2b   :  { %v701_v2 = vsub.s32 0, %v61_v1  ;;  %v703_v3 = vsub.s32 1, %v61_v1  ;;  %v705_v4 = vsub.s32 2, %v61_v1  ;;  %v707_v5 = vsub.s32 3, %v61_v1  ;;  %p604_p4 = scmp.lt.s32.totalorder %s602_s12, %s598_s11 }
  0x2c   :  { %v713_v8 = vsub.s32 4, %v61_v1  ;;  %v715_v9 = vsub.s32 5, %v61_v1  ;;  %v717_v10 = vsub.s32 6, %v61_v1  ;;  %v719_v11 = vsub.s32 7, %v61_v1 }
  0x2d   :  { %v725_v12 = vrot.slane %v709_v6, %v701_v2  ;;  %v729_v13 = vrot.slane %v709_v6, %v703_v3  ;;  %v739_v17 = vrot.slane %v709_v6, %v705_v4  ;;  %v743_v18 = vrot.slane %v709_v6, %v707_v5  ;;  %p605_p5 = por %p604_p4, %p603_p3 }
  0x2e   :  { %v54_v23 = vrot.slane %v53_v19, 4  ;;  %v771_v34 = vrot.slane %v709_v6, %v713_v8  ;;  %v775_v37 = vrot.slane %v709_v6, %v715_v9  ;;  %v779_v38 = vrot.slane %v709_v6, %v717_v10 }
  0x2f   :  { %vm64_vm2 = vcmp.lt.f32.partialorder %v725_v12, %v709_v6  ;;  %vm65_vm3 = vcmp.lt.f32.partialorder %v725_v12, %v711_v7  ;;  %vm76_vm4 = vcmp.lt.f32.partialorder %v729_v13, %v709_v6  ;;  %vm77_vm5 = vcmp.lt.f32.partialorder %v729_v13, %v711_v7  ;;  %p606_p6 = pnand %p605_p5, %p599_p2 }
  0x30   :  { %v501_v20 = vsel %vm64_vm2, 1.0, %v654_v14  ;;  %v502_v21 = vsel %vm65_vm3, 1.0, %v654_v14  ;;  %v503_v22 = vsel %vm76_vm4, 1.0, %v654_v14  ;;  %v504_v24 = vsel %vm77_vm5, 1.0, %v654_v14 }
  0x31   :  { %v82_v25 = vadd.f32 %v503_v22, %v501_v20  ;;  %vm88_vm6 = vcmp.lt.f32.partialorder %v739_v17, %v709_v6  ;;  %v83_v26 = vadd.f32 %v504_v24, %v502_v21  ;;  %vm89_vm7 = vcmp.lt.f32.partialorder %v739_v17, %v711_v7 }
  0x32   :  { %v505_v27 = vsel %vm88_vm6, 1.0, %v654_v14  ;;  %vm100_vm8 = vcmp.lt.f32.partialorder %v743_v18, %v709_v6  ;;  %v55_v28 = vadd.f32 %v54_v23, %v53_v19  ;;  %v506_v29 = vsel %vm89_vm7, 1.0, %v654_v14 }
  0x33   :  { %v94_v30 = vadd.f32 %v505_v27, %v82_v25  ;;  %vm101_vm9 = vcmp.lt.f32.partialorder %v743_v18, %v711_v7  ;;  %v95_v31 = vadd.f32 %v506_v29, %v83_v26  ;;  %v507_v32 = vsel %vm100_vm8, 1.0, %v654_v14 }
  0x34   :  { %v508_v33 = vsel %vm101_vm9, 1.0, %v654_v14  ;;  %v56_v35 = vrot.slane %v55_v28, 2  ;;  %vm112_vm10 = vcmp.lt.f32.partialorder %v771_v34, %v709_v6  ;;  %vm113_vm11 = vcmp.lt.f32.partialorder %v771_v34, %v711_v7 }
  0x35   :  { %v106_v36 = vadd.f32 %v507_v32, %v94_v30  ;;  %v107_v39 = vadd.f32 %v508_v33, %v95_v31  ;;  %v787_v40 = vrot.slane %v709_v6, %v719_v11  ;;  %v509_v42 = vsel %vm112_vm10, 1.0, %v654_v14 }
  0x36   :  { %v57_v41 = vadd.f32 %v56_v35, %v55_v28  ;;  %v510_v43 = vsel %vm113_vm11, 1.0, %v654_v14  ;;  %vm124_vm12 = vcmp.lt.f32.partialorder %v775_v37, %v709_v6  ;;  %vm125_vm13 = vcmp.lt.f32.partialorder %v775_v37, %v711_v7 }
  0x37   :  { %v118_v44 = vadd.f32 %v509_v42, %v106_v36  ;;  %v119_v45 = vadd.f32 %v510_v43, %v107_v39  ;;  %v511_v46 = vsel %vm124_vm12, 1.0, %v654_v14  ;;  %v512_v48 = vsel %vm125_vm13, 1.0, %v654_v14 }
  0x38   :  { %v58_v47 = vrot.slane %v57_v41, 1  ;;  %vm136_vm14 = vcmp.lt.f32.partialorder %v779_v38, %v709_v6  ;;  %vm137_vm15 = vcmp.lt.f32.partialorder %v779_v38, %v711_v7  ;;  %vm148_vm2 = vcmp.lt.f32.partialorder %v787_v40, %v709_v6 }
  0x39   :  { %v130_v49 = vadd.f32 %v511_v46, %v118_v44  ;;  %v131_v50 = vadd.f32 %v512_v48, %v119_v45  ;;  %v513_v51 = vsel %vm136_vm14, 1.0, %v654_v14  ;;  %v514_v52 = vsel %vm137_vm15, 1.0, %v654_v14 }
  0x3a   :  { %v803_v53 = vadd.f32 %v58_v47, %v57_v41  ;;  %vm149_vm3 = vcmp.lt.f32.partialorder %v787_v40, %v711_v7  ;;  %v811_v54 = vrot.slane %v711_v7, %v701_v2  ;;  %v515_v57 = vsel %vm148_vm2, 1.0, %v654_v14 }
  0x3b   :  { %v142_v55 = vadd.f32 %v513_v51, %v130_v49  ;;  %v143_v56 = vadd.f32 %v514_v52, %v131_v50  ;;  %v516_v58 = vsel %vm149_vm3, 1.0, %v654_v14  ;;  %v821_v59 = vrot.slane %v711_v7, %v703_v3 }
  0x3c   :  { %vm160_vm4 = vcmp.lt.f32.partialorder %v811_v54, %v709_v6  ;;  %vm161_vm5 = vcmp.lt.f32.partialorder %v811_v54, %v711_v7  ;;  %v825_v60 = vrot.slane %v711_v7, %v705_v4  ;;  %v843_v22 = vrot.slane %v711_v7, %v707_v5 }
  0x3d   :  { %v154_v61 = vadd.f32 %v515_v57, %v142_v55  ;;  %v155_v62 = vadd.f32 %v516_v58, %v143_v56  ;;  %v517_v63 = vsel %vm160_vm4, 1.0, %v654_v14  ;;  %v518_v0 = vsel %vm161_vm5, 1.0, %v654_v14  ;;  %v924_v58 = vld [vmem:[#allocation2] sm:$0xff] }
  0x3e   :  { %vm172_vm6 = vcmp.lt.f32.partialorder %v821_v59, %v709_v6  ;;  %vm173_vm7 = vcmp.lt.f32.partialorder %v821_v59, %v711_v7  ;;  %vm184_vm8 = vcmp.lt.f32.partialorder %v825_v60, %v709_v6  ;;  %vm185_vm9 = vcmp.lt.f32.partialorder %v825_v60, %v711_v7 }
  0x3f   :  { %v166_v1 = vadd.f32 %v517_v63, %v154_v61  ;;  %v167_v15 = vadd.f32 %v518_v0, %v155_v62  ;;  %v519_v16 = vsel %vm172_vm6, 1.0, %v654_v14  ;;  %v520_v19 = vsel %vm173_vm7, 1.0, %v654_v14  ;;  %v934_v61 = vld [vmem:[#allocation2 + $0x8] sm:$0xff] }
  0x40   :  { %v521_v20 = vsel %vm184_vm8, 1.0, %v654_v14  ;;  %v522_v21 = vsel %vm185_vm9, 1.0, %v654_v14  ;;  %v847_v23 = vrot.slane %v711_v7, %v713_v8  ;;  %v851_v26 = vrot.slane %v711_v7, %v715_v9 }
  0x41   :  { %v178_v24 = vadd.f32 %v519_v16, %v166_v1  ;;  %v179_v25 = vadd.f32 %v520_v19, %v167_v15  ;;  %v855_v27 = vrot.slane %v711_v7, %v717_v10  ;;  %vm196_vm10 = vcmp.lt.f32.partialorder %v843_v22, %v709_v6 }
  0x42   :  { %vm197_vm11 = vcmp.lt.f32.partialorder %v843_v22, %v711_v7  ;;  %vm208_vm12 = vcmp.lt.f32.partialorder %v847_v23, %v709_v6  ;;  %vm209_vm13 = vcmp.lt.f32.partialorder %v847_v23, %v711_v7  ;;  %v523_v30 = vsel %vm196_vm10, 1.0, %v654_v14 }
  0x43   :  { %v190_v28 = vadd.f32 %v521_v20, %v178_v24  ;;  %v191_v29 = vadd.f32 %v522_v21, %v179_v25  ;;  %v524_v31 = vsel %vm197_vm11, 1.0, %v654_v14  ;;  %v525_v32 = vsel %vm208_vm12, 1.0, %v654_v14 }
  0x44   :  { %v526_v33 = vsel %vm209_vm13, 1.0, %v654_v14  ;;  %vm220_vm14 = vcmp.lt.f32.partialorder %v851_v26, %v709_v6  ;;  %vm221_vm15 = vcmp.lt.f32.partialorder %v851_v26, %v711_v7  ;;  %vm232_vm2 = vcmp.lt.f32.partialorder %v855_v27, %v709_v6 }
  0x45   :  { %v202_v35 = vadd.f32 %v523_v30, %v190_v28  ;;  %v203_v36 = vadd.f32 %v524_v31, %v191_v29  ;;  %v527_v39 = vsel %vm220_vm14, 1.0, %v654_v14  ;;  %v528_v41 = vsel %vm221_vm15, 1.0, %v654_v14 }
  0x46   :  { %vm233_vm3 = vcmp.lt.f32.partialorder %v855_v27, %v711_v7  ;;  %v881_v42 = vrot.slane %v711_v7, %v719_v11  ;;  %v533_v43 = vadd.f32 -1.0, %v803_v53  ;;  %v529_v46 = vsel %vm232_vm2, 1.0, %v654_v14 }
  0x47   :  { %v214_v44 = vadd.f32 %v525_v32, %v202_v35  ;;  %v215_v45 = vadd.f32 %v526_v33, %v203_v36  ;;  %v530_v47 = vsel %vm233_vm3, 1.0, %v654_v14  ;;  %vm276_vm6 = vcmp.ge.f32.partialorder %v725_v12, %v709_v6 }
  0x48   :  { %vm244_vm4 = vcmp.lt.f32.partialorder %v881_v42, %v709_v6  ;;  %vm245_vm5 = vcmp.lt.f32.partialorder %v881_v42, %v711_v7  ;;  %vm277_vm7 = vcmp.ge.f32.partialorder %v725_v12, %v711_v7  ;;  %vm286_vm8 = vcmp.ge.f32.partialorder %v729_v13, %v709_v6 }
  0x49   :  { %v226_v48 = vadd.f32 %v527_v39, %v214_v44  ;;  %v227_v49 = vadd.f32 %v528_v41, %v215_v45  ;;  %v531_v50 = vsel %vm244_vm4, 1.0, %v654_v14  ;;  %v532_v51 = vsel %vm245_vm5, 1.0, %v654_v14 }
  0x4a   :  { %vm287_vm9 = vcmp.ge.f32.partialorder %v729_v13, %v711_v7  ;;  %vm377_vm11 = vcmp.ge.f32.partialorder %v825_v60, %v711_v7  ;;  %vm427_vm3 = vcmp.ge.f32.partialorder %v881_v42, %v711_v7 }
  0x4b   :  { %v238_v52 = vadd.f32 %v529_v46, %v226_v48  ;;  %v239_v55 = vadd.f32 %v530_v47, %v227_v49 }
  0x4d   :  { %v916_v56 = vadd.f32 %v531_v50, %v238_v52  ;;  %v918_v57 = vadd.f32 %v532_v51, %v239_v55 }
  0x4f   :  { %vm252_vm4 = vcmp.lt.f32.partialorder %v916_v56, %v803_v53  ;;  %vm253_vm5 = vcmp.lt.f32.partialorder %v918_v57, %v803_v53  ;;  %vm257_vm13 = vcmp.lt.f32.partialorder %v916_v56, %v533_v43  ;;  %vm258_vm15 = vcmp.lt.f32.partialorder %v918_v57, %v533_v43 }
  0x50   :  { %vm254_vm2 = vmand %vm47_vm0, %vm252_vm4  ;;  %vm386_vm4 = vcmp.ge.f32.partialorder %v843_v22, %v709_v6 }
  0x51   :  { %vm255_vm10 = vmand %vm48_vm1, %vm253_vm5  ;;  %v261_v62 = vsel %vm254_vm2, %v924_v58, -1e+30  ;;  %vm397_vm2 = vcmp.ge.f32.partialorder %v847_v23, %v711_v7  ;;  %vm465_vm5 = vcmp.ge.f32.partialorder %v803_v53, 2.0 }
  0x52   :  { %vm963_vm12 = vmand %vm47_vm0, %vm257_vm13  ;;  %v262_v0 = vsel %vm255_vm10, %v934_v61, -1e+30  ;;  %vm416_vm0 = vcmp.ge.f32.partialorder %v855_v27, %v709_v6  ;;  %vm417_vm10 = vcmp.ge.f32.partialorder %v855_v27, %v711_v7  ;;  %vm426_vm13 = vcmp.ge.f32.partialorder %v881_v42, %v709_v6 }
  0x53   :  { %vm978_vm14 = vmand %vm48_vm1, %vm258_vm15  ;;  %v263_v15 = vmax.f32 %v261_v62, %v262_v0  ;;  %v534_v19 = vsel %vm465_vm5, 1.0, %v654_v14 }
  0x54   :  { %468 = vst [vmem:[#allocation8] sm:$0x1] %v534_v19 }
  0x55   :  { %v264_v16 = vrot.slane %v263_v15, 4 }
  0x57   :  { %v265_v20 = vmax.f32 %v263_v15, %v264_v16 }
  0x58   :  { %609 = shalt.err (!%p606_p6)
}
  0x59   :  { %s610_s15 = scalar_lea.hbm %s1145_s3, 16 }
  0x5a   :  { %p611_p7 = scmp.ne.s32.totalorder %s1145_s3, %s610_s15  ;;  %p614_p8 = scmp.lt.u32.totalorder %s610_s15, %s1145_s3 }
  0x5c   :  { %p616_p9 = pnand %p614_p8, %p611_p7 }
  0x5e   :  { %619 = shalt.err (!%p616_p9)
}
  0x5f   :  { %488 = dma.vmem_to_hbm [thread:$0]  %s486_s10, 16, %s1145_s3, [#allocation9]   ;;  %v266_v14 = vrot.slane %v265_v20, 2  ;;  %vm1150_vm1 = vcmp.ge.f32.partialorder %v739_v17, %v709_v6  ;;  %vm1155_vm15 = vcmp.ge.f32.partialorder %v771_v34, %v711_v7  ;;  %vm1156_vm5 = vcmp.ge.f32.partialorder %v775_v37, %v709_v6 }
  0x60   :  { %s656_s3 = smov [#allocation7]  }
  0x61   :  { %v267_v53 = vmax.f32 %v265_v20, %v266_v14  ;;  %s475_s22 = sshll.u32 %s656_s3, 4  ;;  %s476_s22 = int_to_ptr.vmem [resolvable:$true] %s475_s22 }
  0x62   :  { %s620_s23 = scalar_lea.vmem %s476_s22, 16  ;;  %s624_s24 = scalar_lea.vmem %s476_s22, 32 }
  0x63   :  { %v268_v21 = vrot.slane %v267_v53, 1  ;;  %p621_p10 = scmp.ne.s32.totalorder %s476_s22, %s620_s23  ;;  %p625_p11 = scmp.lt.s32.totalorder %s476_s22, %s476_s22 }
  0x64   :  { %p626_p12 = scmp.lt.s32.totalorder %s624_s24, %s620_s23 }
  0x65   :  { %v1004_v24 = vmax.f32 %v267_v53, %v268_v21 }
  0x66   :  { %p627_p13 = por %p626_p12, %p625_p11 }
  0x67   :  { %v270_v25 = vsub.f32 %v261_v62, %v1004_v24  ;;  %v271_v29 = vsub.f32 %v262_v0, %v1004_v24 }
  0x68   :  { %p628_p0 = pnand %p627_p13, %p621_p10 }
  0x69   :  { %v272_v28 = vmul.f32 1.442695, %v270_v25  ;;  %v274_v30 = vmul.f32 1.442695, %v271_v29 }
  0x6b   :  { %542 = vpow2.f32 %v272_v28 }
  0x6c   :  { %544 = vpow2.f32 %v274_v30 }
  0x75   :  { %v543_v31 = vpop.eup %542 }
  0x76   :  { %v281_v32 = vrot.slane %v543_v31, %v701_v2  ;;  %v291_v33 = vrot.slane %v543_v31, %v703_v3  ;;  %v301_v35 = vrot.slane %v543_v31, %v705_v4  ;;  %v311_v36 = vrot.slane %v543_v31, %v707_v5  ;;  %v545_v0 = vpop.eup %544 }
  0x77   :  { %v321_v39 = vrot.slane %v543_v31, %v713_v8  ;;  %v331_v13 = vrot.slane %v543_v31, %v715_v9  ;;  %v341_v62 = vrot.slane %v543_v31, %v717_v10  ;;  %v351_v20 = vrot.slane %v543_v31, %v719_v11 }
  0x78   :  { %v282_v41 = vsel %vm276_vm6, %v281_v32, 0.0  ;;  %v283_v43 = vsel %vm277_vm7, %v281_v32, 0.0  ;;  %v292_v44 = vsel %vm286_vm8, %v291_v33, 0.0  ;;  %v293_v45 = vsel %vm287_vm9, %v291_v33, 0.0 }
  0x79   :  { %v294_v46 = vadd.f32 %v292_v44, %v282_v41  ;;  %v295_v47 = vadd.f32 %v293_v45, %v283_v43  ;;  %v302_v48 = vsel %vm1150_vm1, %v301_v35, 0.0  ;;  %vm1151_vm6 = vcmp.ge.f32.partialorder %v739_v17, %v711_v7 }
  0x7a   :  { %v303_v49 = vsel %vm1151_vm6, %v301_v35, 0.0  ;;  %vm1152_vm7 = vcmp.ge.f32.partialorder %v743_v18, %v709_v6  ;;  %vm1153_vm8 = vcmp.ge.f32.partialorder %v743_v18, %v711_v7  ;;  %vm1154_vm9 = vcmp.ge.f32.partialorder %v771_v34, %v709_v6 }
  0x7b   :  { %v312_v12 = vsel %vm1152_vm7, %v311_v36, 0.0  ;;  %v313_v50 = vsel %vm1153_vm8, %v311_v36, 0.0  ;;  %v304_v51 = vadd.f32 %v302_v48, %v294_v46  ;;  %v305_v52 = vadd.f32 %v303_v49, %v295_v47 }
  0x7c   :  { %v322_v55 = vsel %vm1154_vm9, %v321_v39, 0.0  ;;  %v323_v17 = vsel %vm1155_vm15, %v321_v39, 0.0  ;;  %v332_v18 = vsel %vm1156_vm5, %v331_v13, 0.0  ;;  %vm1157_vm1 = vcmp.ge.f32.partialorder %v775_v37, %v711_v7 }
  0x7d   :  { %v314_v15 = vadd.f32 %v312_v12, %v304_v51  ;;  %v315_v16 = vadd.f32 %v313_v50, %v305_v52  ;;  %v333_v19 = vsel %vm1157_vm1, %v331_v13, 0.0  ;;  %vm1158_vm6 = vcmp.ge.f32.partialorder %v779_v38, %v709_v6 }
  0x7e   :  { %v342_v34 = vsel %vm1158_vm6, %v341_v62, 0.0  ;;  %vm1159_vm7 = vcmp.ge.f32.partialorder %v779_v38, %v711_v7  ;;  %v361_v25 = vrot.slane %v545_v0, %v701_v2  ;;  %vm1160_vm8 = vcmp.ge.f32.partialorder %v787_v40, %v709_v6 }
  0x7f   :  { %v324_v14 = vadd.f32 %v322_v55, %v314_v15  ;;  %v325_v53 = vadd.f32 %v323_v17, %v315_v16  ;;  %v343_v21 = vsel %vm1159_vm7, %v341_v62, 0.0  ;;  %v352_v37 = vsel %vm1160_vm8, %v351_v20, 0.0 }
  0x80   :  { %vm1161_vm9 = vcmp.ge.f32.partialorder %v787_v40, %v711_v7  ;;  %v371_v31 = vrot.slane %v545_v0, %v703_v3  ;;  %vm1162_vm15 = vcmp.ge.f32.partialorder %v811_v54, %v709_v6  ;;  %vm1163_vm5 = vcmp.ge.f32.partialorder %v811_v54, %v711_v7 }
  0x81   :  { %v334_v28 = vadd.f32 %v332_v18, %v324_v14  ;;  %v335_v29 = vadd.f32 %v333_v19, %v325_v53  ;;  %v353_v30 = vsel %vm1161_vm9, %v351_v20, 0.0  ;;  %v362_v38 = vsel %vm1162_vm15, %v361_v25, 0.0 }
  0x82   :  { %v363_v2 = vsel %vm1163_vm5, %v361_v25, 0.0  ;;  %v381_v35 = vrot.slane %v545_v0, %v705_v4  ;;  %vm1164_vm1 = vcmp.ge.f32.partialorder %v821_v59, %v709_v6  ;;  %vm1165_vm6 = vcmp.ge.f32.partialorder %v821_v59, %v711_v7 }
  0x83   :  { %v344_v32 = vadd.f32 %v342_v34, %v334_v28  ;;  %v345_v33 = vadd.f32 %v343_v21, %v335_v29  ;;  %v372_v40 = vsel %vm1164_vm1, %v371_v31, 0.0  ;;  %v373_v3 = vsel %vm1165_vm6, %v371_v31, 0.0 }
  0x84   :  { %v391_v41 = vrot.slane %v545_v0, %v707_v5  ;;  %vm1166_vm7 = vcmp.ge.f32.partialorder %v825_v60, %v709_v6  ;;  %v383_v4 = vsel %vm377_vm11, %v381_v35, 0.0  ;;  %v401_v45 = vrot.slane %v545_v0, %v713_v8 }
  0x85   :  { %v354_v36 = vadd.f32 %v352_v37, %v344_v32  ;;  %v355_v39 = vadd.f32 %v353_v30, %v345_v33  ;;  %v382_v54 = vsel %vm1166_vm7, %v381_v35, 0.0  ;;  %vm1167_vm8 = vcmp.ge.f32.partialorder %v843_v22, %v711_v7 }
  0x86   :  { %v392_v59 = vsel %vm386_vm4, %v391_v41, 0.0  ;;  %v393_v5 = vsel %vm1167_vm8, %v391_v41, 0.0  ;;  %v411_v48 = vrot.slane %v545_v0, %v715_v9  ;;  %vm1168_vm9 = vcmp.ge.f32.partialorder %v847_v23, %v709_v6 }
  0x87   :  { %v364_v43 = vadd.f32 %v362_v38, %v354_v36  ;;  %v365_v44 = vadd.f32 %v363_v2, %v355_v39  ;;  %v402_v60 = vsel %vm1168_vm9, %v401_v45, 0.0  ;;  %v403_v8 = vsel %vm397_vm2, %v401_v45, 0.0 }
  0x88   :  { %v421_v50 = vrot.slane %v545_v0, %v717_v10  ;;  %vm1169_vm11 = vcmp.ge.f32.partialorder %v851_v26, %v709_v6  ;;  %vm1170_vm4 = vcmp.ge.f32.partialorder %v851_v26, %v711_v7  ;;  %v431_v52 = vrot.slane %v545_v0, %v719_v11 }
  0x89   :  { %v374_v46 = vadd.f32 %v372_v40, %v364_v43  ;;  %v375_v47 = vadd.f32 %v373_v3, %v365_v44  ;;  %v412_v22 = vsel %vm1169_vm11, %v411_v48, 0.0  ;;  %v413_v9 = vsel %vm1170_vm4, %v411_v48, 0.0 }
  0x8a   :  { %v422_v23 = vsel %vm416_vm0, %v421_v50, 0.0  ;;  %v423_v10 = vsel %vm417_vm10, %v421_v50, 0.0  ;;  %v432_v16 = vsel %vm426_vm13, %v431_v52, 0.0  ;;  %v433_v11 = vsel %vm427_vm3, %v431_v52, 0.0 }
  0x8b   :  { %v384_v49 = vadd.f32 %v382_v54, %v374_v46  ;;  %v385_v12 = vadd.f32 %v383_v4, %v375_v47  ;;  %v444_v20 = vmul.f32 -0.22314355, %v916_v56  ;;  %v445_v14 = vmul.f32 -0.22314355, %v918_v57 }
  0x8d   :  { %v394_v13 = vadd.f32 %v392_v59, %v384_v49  ;;  %v395_v51 = vadd.f32 %v393_v5, %v385_v12  ;;  %v446_v34 = vmul.f32 1.442695, %v444_v20  ;;  %v448_v21 = vmul.f32 1.442695, %v445_v14 }
  0x8f   :  { %v404_v55 = vadd.f32 %v402_v60, %v394_v13  ;;  %v405_v17 = vadd.f32 %v403_v8, %v395_v51 }
  0x91   :  { %v414_v62 = vadd.f32 %v412_v22, %v404_v55  ;;  %v415_v15 = vadd.f32 %v413_v9, %v405_v17 }
  0x93   :  { %v424_v26 = vadd.f32 %v422_v23, %v414_v62  ;;  %v425_v0 = vadd.f32 %v423_v10, %v415_v15 }
  0x95   :  { %v434_v18 = vadd.f32 %v432_v16, %v424_v26  ;;  %v435_v19 = vadd.f32 %v433_v11, %v425_v0 }
  0x97   :  { %v436_v27 = vmax.f32 %v434_v18, 1e-30  ;;  %v437_v53 = vmax.f32 %v435_v19, 1e-30 }
  0x99   :  { %546 = vlog2.f32 %v436_v27 }
  0x9a   :  { %548 = vlog2.f32 %v437_v53 }
  0x9b   :  { %550 = vpow2.f32 %v446_v34 }
  0x9c   :  { %552 = vpow2.f32 %v448_v21 }
  0xa3   :  { %v547_v6 = vpop.eup %546 }
  0xa4   :  { %v549_v25 = vpop.eup %548  ;;  %v439_v7 = vmul.f32 0.6931472, %v547_v6 }
  0xa5   :  { %v441_v42 = vmul.f32 0.6931472, %v549_v25  ;;  %v551_v29 = vpop.eup %550 }
  0xa6   :  { %v442_v28 = vadd.f32 %v439_v7, %v1004_v24  ;;  %v553_v56 = vpop.eup %552 }
  0xa7   :  { %v443_v37 = vadd.f32 %v441_v42, %v1004_v24 }
  0xa8   :  { %v450_v57 = vsub.f32 %v924_v58, %v442_v28 }
  0xa9   :  { %v451_v30 = vsub.f32 %v934_v61, %v443_v37 }
  0xaa   :  { %v452_v31 = vmul.f32 %v551_v29, %v450_v57 }
  0xab   :  { %v453_v32 = vmul.f32 %v553_v56, %v451_v30 }
  0xac   :  { %v454_v33 = vsel %vm963_vm12, %v452_v31, 0.0 }
  0xad   :  { %v455_v38 = vsel %vm978_vm14, %v453_v32, 0.0 }
  0xae   :  { %v456_v2 = vadd.f32 %v455_v38, %v454_v33 }
  0xb0   :  { %v457_v35 = vrot.slane %v456_v2, 4 }
  0xb2   :  { %v458_v36 = vadd.f32 %v457_v35, %v456_v2 }
  0xb4   :  { %v459_v39 = vrot.slane %v458_v36, 2 }
  0xb6   :  { %v460_v40 = vadd.f32 %v459_v39, %v458_v36 }
  0xb8   :  { %v461_v3 = vrot.slane %v460_v40, 1 }
  0xba   :  { %v462_v24 = vadd.f32 %v461_v3, %v460_v40 }
  0xbc   :  { %v463_v58 = vsub.f32 0.0, %v462_v24 }
  0xbe   :  { %464 = vst [vmem:[#allocation7] sm:$0x1] %v463_v58 }
  0xbf   :  { %631 = shalt.err (!%p628_p0)
}
  0xc0   :  { %s632_s27 = scalar_lea.hbm %s1144_s2, 16 }
  0xc1   :  { %p633_p1 = scmp.ne.s32.totalorder %s1144_s2, %s632_s27  ;;  %p636_p2 = scmp.lt.u32.totalorder %s632_s27, %s1144_s2 }
  0xc3   :  { %p638_p3 = pnand %p636_p2, %p633_p1 }
  0xc5   :  { %641 = shalt.err (!%p638_p3)
}
  0xc6   :  { %478 = dma.vmem_to_hbm [thread:$0]  %s476_s22, 16, %s1144_s2, [#allocation4]  }
  0xc7   :  { %646 = dma.done.wait [#allocation4], 16  }
  0xc8   :  { %647 = vsyncadd [#allocation4], 4294967280 }
  0xc9   :  { %648 = dma.done.wait [#allocation9], 16  }
  0xca   :  { %649 = vsyncadd [#allocation9], 4294967280 }
  0xcb   :  { %495 = vsyncpa [#allocation3], 1 }
  0xcc   :  { %496 = vsyncpa [#allocation6], 1 }
  0xcd   :  { %497 = vsyncpa [#allocation4], 1 }
  0xce   :  { %498 = vsyncpa [#allocation9], 1 }

</bundles_post_ra>
